<compile_context>
chip_gen: v7x
topology: tpu7x:2x2x1
jax: 0.10.0
libtpu: 0.0.40
codegen_flags: <defaults>
</compile_context>

<pallas_src>
import functools

import jax
import jax.numpy as jnp
from jax import lax
from jax.experimental import pallas as pl
from jax.experimental.pallas import tpu as pltpu


def lr_kernel(xT_ref, w_ref, out_ref, *, v_chunk, chunks_per_slab, slabs_per_split):
    # xT_ref : (F, B_TILE)                int32   feature ids, batch along lanes
    #                                             (block resident across the slab axis)
    # w_ref  : (chunks_per_slab, v_chunk) float32 one weight slab; row c = vocab chunk c
    # out_ref: (1, B_TILE)                float32 lane-dense output tile, resident
    #                                             across the slab axis (accumulator)
    s = pl.program_id(0)            # vocab split   (parallel; feeds 2nd TC on v7x)
    v = pl.program_id(2)            # slab in split (arbitrary / reduction axis)

    F = xT_ref.shape[0]
    B_TILE = out_ref.shape[1]

    v_slab = chunks_per_slab * v_chunk
    slab_start = (s * slabs_per_split + v) * v_slab   # absolute vocab offset of this slab

    # Hoisted out of both loops (JAX does not CSE broadcast_in_dim):
    # vocab offsets of one 128-wide chunk laid out along sublanes.
    vocab_iota = lax.broadcasted_iota(jnp.int32, (v_chunk, B_TILE), 0)

    def chunk_body(c, partial):
        w_c = w_ref[pl.ds(c, 1), :]                    # (1, v_chunk) sublane slice
        chunk_start = slab_start + c * v_chunk

        def field_body(f, counts):
            xf = xT_ref[pl.ds(f, 1), :]                # (1, B_TILE) int32
            xf_rel = xf - chunk_start                  # ids relative to this chunk
            # One compare + select + add per field over 16 f32 vregs (pure VPU).
            return counts + jnp.where(xf_rel == vocab_iota, 1.0, 0.0)

        counts = lax.fori_loop(
            0, F, field_body,
            jnp.zeros((v_chunk, B_TILE), jnp.float32),
            unroll=True,                               # F is small & static
        )                                              # (v_chunk, B_TILE)

        # Combine with weights on the (otherwise idle) MXU; batch stays lane-dense.
        return partial + jnp.dot(w_c, counts, preferred_element_type=jnp.float32)

    # Register-resident partial; one out_ref touch per slab (not per chunk).
    partial = lax.fori_loop(
        0, chunks_per_slab, chunk_body,
        jnp.zeros((1, B_TILE), jnp.float32),
    )

    @pl.when(v == 0)
    def _():
        out_ref[...] = partial                         # init accumulator

    @pl.when(v > 0)
    def _():
        out_ref[...] += partial                        # accumulate over slabs

    # TODO(synk): final_activation is None in the default module config; if a
    # nonlinearity (e.g. sigmoid) were configured it would be applied at the
    # last slab (or in the wrapper after the split reduction).


def lr_layer_forward(x, w, bias, *, b_tile=128, v_chunk=128,
                     chunks_per_slab=32, num_splits=2):
    """x: (B, F) int feature ids, w: (V, 1) float table, bias: (1,) float -> (B, 1)."""
    B, F = x.shape
    V = w.shape[0]

    # DMA slab sizing (decoupled from the 128-wide in-register chunk). Clamp the
    # slab for tiny vocabularies; keep it a multiple of 8 chunks for the (8,128)
    # block constraint on the (chunks, 128) weight layout.
    per_split = pl.cdiv(V, num_splits)
    chunks_needed = pl.cdiv(per_split, v_chunk)
    chunks_per_slab = max(8, min(chunks_per_slab, pl.cdiv(chunks_needed, 8) * 8))
    v_slab = chunks_per_slab * v_chunk
    slabs_per_split = pl.cdiv(per_split, v_slab)
    V_pad = num_splits * slabs_per_split * v_slab

    B_pad = pl.cdiv(B, b_tile) * b_tile

    # Layout plumbing in the wrapper (cheap XLA ops):
    #  - x transposed so batch is the lane (last) axis; padded lanes use id 0
    #    and are sliced off below.
    #  - the (V, 1) weight column becomes a (V_pad/128, 128) lane-dense chunk
    #    matrix; padded vocab slots get weight 0.
    xT = jnp.pad(x.T.astype(jnp.int32), ((0, 0), (0, B_pad - B)))
    w_rows = jnp.pad(w.astype(jnp.float32).reshape(-1),
                     (0, V_pad - V)).reshape(V_pad // v_chunk, v_chunk)

    grid = (num_splits, B_pad // b_tile, slabs_per_split)

    kernel = functools.partial(
        lr_kernel,
        v_chunk=v_chunk,
        chunks_per_slab=chunks_per_slab,
        slabs_per_split=slabs_per_split,
    )

    out = pl.pallas_call(
        kernel,
        out_shape=jax.ShapeDtypeStruct((num_splits, 1, B_pad), jnp.float32),
        grid=grid,
        in_specs=[
            # X tile: resident across the slab axis.
            pl.BlockSpec((F, b_tile), lambda s, i, v: (0, i)),
            # Weight slab: streams over (split, slab).
            pl.BlockSpec((chunks_per_slab, v_chunk),
                         lambda s, i, v: (s * slabs_per_split + v, 0)),
        ],
        # Output tile: resident across the slab (reduction) axis, one per split.
        out_specs=pl.BlockSpec((None, 1, b_tile), lambda s, i, v: (s, 0, i)),
        compiler_params=pltpu.CompilerParams(
            dimension_semantics=("parallel", "parallel", "arbitrary"),
        ),
    )(xT, w_rows)

    # Reduce the per-split partials, slice off batch padding, add the bias once.
    result = out.sum(axis=0)[0, :B].reshape(B, 1)
    return result + bias.astype(jnp.float32).reshape(1, 1)


if __name__ == "__main__":
    key = jax.random.PRNGKey(0)
    k_idx, k_w, k_b = jax.random.split(key, 3)

    batch = 8          # B
    num_fields = 8     # F (fields per example)
    vocab = 300        # V (shared vocab) -> exercises padding + both vocab splits

    x = jax.random.randint(k_idx, (batch, num_fields), 0, vocab, dtype=jnp.int32)
    w = jax.random.normal(k_w, (vocab, 1), dtype=jnp.float32) * 0.01
    bias = jax.random.normal(k_b, (1,), dtype=jnp.float32)

    out = jax.block_until_ready(lr_layer_forward(x, w, bias))

    # Pure-JAX reference: embedding lookup -> sum over fields -> + bias.
    ref = jnp.sum(w[x, 0], axis=1, keepdims=True) + bias

    assert out.shape == (batch, 1)
    assert jnp.allclose(out, ref, atol=1e-5, rtol=1e-5)
    print("KERNEL_OK")
</pallas_src>

<mosaic_0001>
module attributes {stable_mosaic.version = 11 : i64} {
  func.func @lr_kernel(%arg0: i32, %arg1: i32, %arg2: i32, %arg3: memref<8x128xi32, #tpu.memory_space<vmem>>, %arg4: memref<8x128xf32, #tpu.memory_space<vmem>>, %arg5: memref<1x1x128xf32, #tpu.memory_space<vmem>>) attributes {dimension_semantics = [#tpu.dimension_semantics<parallel>, #tpu.dimension_semantics<parallel>, #tpu.dimension_semantics<arbitrary>], iteration_bounds = array<i64: 2, 1, 1>, scalar_prefetch = 0 : i64, scratch_operands = 0 : i64, tpu.core_type = #tpu.core_type<tc>, window_params = [{transform_indices = @transform_0, window_bounds = array<i64: 8, 128>}, {transform_indices = @transform_1, window_bounds = array<i64: 8, 128>}, {transform_indices = @transform_2, window_bounds = array<i64: 1, 1, 128>}]} {
    %c1_i32 = arith.constant 1 : i32
    %0 = arith.muli %arg0, %c1_i32 : i32
    %1 = arith.addi %0, %arg2 : i32
    %c1024_i32 = arith.constant 1024 : i32
    %2 = arith.muli %1, %c1024_i32 : i32
    %3 = tpu.iota {dimensions = array<i32: 0>} : vector<128x128xi32>
    %cst = arith.constant 0.000000e+00 : f32
    %4 = vector.broadcast %cst : f32 to vector<1x128xf32>
    %c0_i32 = arith.constant 0 : i32
    %c8_i32 = arith.constant 8 : i32
    %5 = arith.addi %c0_i32, %c8_i32 : i32
    %c1_i32_0 = arith.constant 1 : i32
    %6 = scf.for %arg6 = %c0_i32 to %5 step %c1_i32_0 iter_args(%arg7 = %4) -> (vector<1x128xf32>)  : i32 {
      %13 = arith.index_cast %arg6 : i32 to index
      %c0 = arith.constant 0 : index
      %14 = vector.load %arg4[%13, %c0] : memref<8x128xf32, #tpu.memory_space<vmem>>, vector<1x128xf32>
      %c128_i32 = arith.constant 128 : i32
      %15 = arith.muli %arg6, %c128_i32 : i32
      %16 = arith.addi %2, %15 : i32
      %cst_6 = arith.constant 0.000000e+00 : f32
      %17 = vector.broadcast %cst_6 : f32 to vector<128x128xf32>
      %c0_i32_7 = arith.constant 0 : i32
      %18 = arith.index_cast %c0_i32_7 : i32 to index
      %c0_8 = arith.constant 0 : index
      %19 = vector.load %arg3[%18, %c0_8] : memref<8x128xi32, #tpu.memory_space<vmem>>, vector<1x128xi32>
      %20 = vector.broadcast %16 : i32 to vector<1x128xi32>
      %21 = arith.subi %19, %20 : vector<1x128xi32>
      %22 = vector.broadcast %21 : vector<1x128xi32> to vector<128x128xi32>
      %23 = arith.cmpi eq, %22, %3 : vector<128x128xi32>
      %cst_9 = arith.constant 1.000000e+00 : f32
      %cst_10 = arith.constant 0.000000e+00 : f32
      %24 = vector.broadcast %cst_9 : f32 to vector<128x128xf32>
      %25 = vector.broadcast %cst_10 : f32 to vector<128x128xf32>
      %26 = arith.select %23, %24, %25 : vector<128x128xi1>, vector<128x128xf32>
      %27 = arith.addf %17, %26 : vector<128x128xf32>
      %c1_i32_11 = arith.constant 1 : i32
      %28 = arith.index_cast %c1_i32_11 : i32 to index
      %c0_12 = arith.constant 0 : index
      %29 = vector.load %arg3[%28, %c0_12] : memref<8x128xi32, #tpu.memory_space<vmem>>, vector<1x128xi32>
      %30 = vector.broadcast %16 : i32 to vector<1x128xi32>
      %31 = arith.subi %29, %30 : vector<1x128xi32>
      %32 = vector.broadcast %31 : vector<1x128xi32> to vector<128x128xi32>
      %33 = arith.cmpi eq, %32, %3 : vector<128x128xi32>
      %cst_13 = arith.constant 1.000000e+00 : f32
      %cst_14 = arith.constant 0.000000e+00 : f32
      %34 = vector.broadcast %cst_13 : f32 to vector<128x128xf32>
      %35 = vector.broadcast %cst_14 : f32 to vector<128x128xf32>
      %36 = arith.select %33, %34, %35 : vector<128x128xi1>, vector<128x128xf32>
      %37 = arith.addf %27, %36 : vector<128x128xf32>
      %c2_i32 = arith.constant 2 : i32
      %38 = arith.index_cast %c2_i32 : i32 to index
      %c0_15 = arith.constant 0 : index
      %39 = vector.load %arg3[%38, %c0_15] : memref<8x128xi32, #tpu.memory_space<vmem>>, vector<1x128xi32>
      %40 = vector.broadcast %16 : i32 to vector<1x128xi32>
      %41 = arith.subi %39, %40 : vector<1x128xi32>
      %42 = vector.broadcast %41 : vector<1x128xi32> to vector<128x128xi32>
      %43 = arith.cmpi eq, %42, %3 : vector<128x128xi32>
      %cst_16 = arith.constant 1.000000e+00 : f32
      %cst_17 = arith.constant 0.000000e+00 : f32
      %44 = vector.broadcast %cst_16 : f32 to vector<128x128xf32>
      %45 = vector.broadcast %cst_17 : f32 to vector<128x128xf32>
      %46 = arith.select %43, %44, %45 : vector<128x128xi1>, vector<128x128xf32>
      %47 = arith.addf %37, %46 : vector<128x128xf32>
      %c3_i32 = arith.constant 3 : i32
      %48 = arith.index_cast %c3_i32 : i32 to index
      %c0_18 = arith.constant 0 : index
      %49 = vector.load %arg3[%48, %c0_18] : memref<8x128xi32, #tpu.memory_space<vmem>>, vector<1x128xi32>
      %50 = vector.broadcast %16 : i32 to vector<1x128xi32>
      %51 = arith.subi %49, %50 : vector<1x128xi32>
      %52 = vector.broadcast %51 : vector<1x128xi32> to vector<128x128xi32>
      %53 = arith.cmpi eq, %52, %3 : vector<128x128xi32>
      %cst_19 = arith.constant 1.000000e+00 : f32
      %cst_20 = arith.constant 0.000000e+00 : f32
      %54 = vector.broadcast %cst_19 : f32 to vector<128x128xf32>
      %55 = vector.broadcast %cst_20 : f32 to vector<128x128xf32>
      %56 = arith.select %53, %54, %55 : vector<128x128xi1>, vector<128x128xf32>
      %57 = arith.addf %47, %56 : vector<128x128xf32>
      %c4_i32 = arith.constant 4 : i32
      %58 = arith.index_cast %c4_i32 : i32 to index
      %c0_21 = arith.constant 0 : index
      %59 = vector.load %arg3[%58, %c0_21] : memref<8x128xi32, #tpu.memory_space<vmem>>, vector<1x128xi32>
      %60 = vector.broadcast %16 : i32 to vector<1x128xi32>
      %61 = arith.subi %59, %60 : vector<1x128xi32>
      %62 = vector.broadcast %61 : vector<1x128xi32> to vector<128x128xi32>
      %63 = arith.cmpi eq, %62, %3 : vector<128x128xi32>
      %cst_22 = arith.constant 1.000000e+00 : f32
      %cst_23 = arith.constant 0.000000e+00 : f32
      %64 = vector.broadcast %cst_22 : f32 to vector<128x128xf32>
      %65 = vector.broadcast %cst_23 : f32 to vector<128x128xf32>
      %66 = arith.select %63, %64, %65 : vector<128x128xi1>, vector<128x128xf32>
      %67 = arith.addf %57, %66 : vector<128x128xf32>
      %c5_i32 = arith.constant 5 : i32
      %68 = arith.index_cast %c5_i32 : i32 to index
      %c0_24 = arith.constant 0 : index
      %69 = vector.load %arg3[%68, %c0_24] : memref<8x128xi32, #tpu.memory_space<vmem>>, vector<1x128xi32>
      %70 = vector.broadcast %16 : i32 to vector<1x128xi32>
      %71 = arith.subi %69, %70 : vector<1x128xi32>
      %72 = vector.broadcast %71 : vector<1x128xi32> to vector<128x128xi32>
      %73 = arith.cmpi eq, %72, %3 : vector<128x128xi32>
      %cst_25 = arith.constant 1.000000e+00 : f32
      %cst_26 = arith.constant 0.000000e+00 : f32
      %74 = vector.broadcast %cst_25 : f32 to vector<128x128xf32>
      %75 = vector.broadcast %cst_26 : f32 to vector<128x128xf32>
      %76 = arith.select %73, %74, %75 : vector<128x128xi1>, vector<128x128xf32>
      %77 = arith.addf %67, %76 : vector<128x128xf32>
      %c6_i32 = arith.constant 6 : i32
      %78 = arith.index_cast %c6_i32 : i32 to index
      %c0_27 = arith.constant 0 : index
      %79 = vector.load %arg3[%78, %c0_27] : memref<8x128xi32, #tpu.memory_space<vmem>>, vector<1x128xi32>
      %80 = vector.broadcast %16 : i32 to vector<1x128xi32>
      %81 = arith.subi %79, %80 : vector<1x128xi32>
      %82 = vector.broadcast %81 : vector<1x128xi32> to vector<128x128xi32>
      %83 = arith.cmpi eq, %82, %3 : vector<128x128xi32>
      %cst_28 = arith.constant 1.000000e+00 : f32
      %cst_29 = arith.constant 0.000000e+00 : f32
      %84 = vector.broadcast %cst_28 : f32 to vector<128x128xf32>
      %85 = vector.broadcast %cst_29 : f32 to vector<128x128xf32>
      %86 = arith.select %83, %84, %85 : vector<128x128xi1>, vector<128x128xf32>
      %87 = arith.addf %77, %86 : vector<128x128xf32>
      %c7_i32 = arith.constant 7 : i32
      %88 = arith.index_cast %c7_i32 : i32 to index
      %c0_30 = arith.constant 0 : index
      %89 = vector.load %arg3[%88, %c0_30] : memref<8x128xi32, #tpu.memory_space<vmem>>, vector<1x128xi32>
      %90 = vector.broadcast %16 : i32 to vector<1x128xi32>
      %91 = arith.subi %89, %90 : vector<1x128xi32>
      %92 = vector.broadcast %91 : vector<1x128xi32> to vector<128x128xi32>
      %93 = arith.cmpi eq, %92, %3 : vector<128x128xi32>
      %cst_31 = arith.constant 1.000000e+00 : f32
      %cst_32 = arith.constant 0.000000e+00 : f32
      %94 = vector.broadcast %cst_31 : f32 to vector<128x128xf32>
      %95 = vector.broadcast %cst_32 : f32 to vector<128x128xf32>
      %96 = arith.select %93, %94, %95 : vector<128x128xi1>, vector<128x128xf32>
      %97 = arith.addf %87, %96 : vector<128x128xf32>
      %c8_i32_33 = arith.constant 8 : i32
      %cst_34 = arith.constant dense<0.000000e+00> : vector<1x128xf32>
      %98 = tpu.matmul %14, %97, %cst_34 {dimension_numbers = #tpu.dot_dimension_numbers<[1], [0], [0], [1], [0, 0, 1, 1], [], []>} : vector<1x128xf32>, vector<128x128xf32>, vector<1x128xf32> -> vector<1x128xf32>
      %99 = arith.addf %arg7, %98 : vector<1x128xf32>
      scf.yield %99 : vector<1x128xf32>
    }
    %c8_i32_1 = arith.constant 8 : i32
    %c0_i32_2 = arith.constant 0 : i32
    %7 = arith.cmpi eq, %arg2, %c0_i32_2 : i32
    %8 = arith.extui %7 : i1 to i32
    %c0_i32_3 = arith.constant 0 : i32
    %9 = arith.cmpi ne, %8, %c0_i32_3 : i32
    scf.if %9 {
      %c0 = arith.constant 0 : index
      %c0_6 = arith.constant 0 : index
      %c0_7 = arith.constant 0 : index
      %13 = vector.load %arg5[%c0, %c0_6, %c0_7] : memref<1x1x128xf32, #tpu.memory_space<vmem>>, vector<1x1x128xf32>
      %14 = vector.shape_cast %13 : vector<1x1x128xf32> to vector<1x128xf32>
      %15 = vector.shape_cast %6 : vector<1x128xf32> to vector<1x1x128xf32>
      tpu.vector_store %arg5[%c0, %c0_6, %c0_7], %15 {strides = array<i32>} : memref<1x1x128xf32, #tpu.memory_space<vmem>>, vector<1x1x128xf32>,
    } else {
    }
    %c0_i32_4 = arith.constant 0 : i32
    %10 = arith.cmpi sgt, %arg2, %c0_i32_4 : i32
    %11 = arith.extui %10 : i1 to i32
    %c0_i32_5 = arith.constant 0 : i32
    %12 = arith.cmpi ne, %11, %c0_i32_5 : i32
    scf.if %12 {
      %c0 = arith.constant 0 : index
      %c0_6 = arith.constant 0 : index
      %c0_7 = arith.constant 0 : index
      %13 = vector.load %arg5[%c0, %c0_6, %c0_7] : memref<1x1x128xf32, #tpu.memory_space<vmem>>, vector<1x1x128xf32>
      %14 = vector.shape_cast %13 : vector<1x1x128xf32> to vector<1x128xf32>
      %15 = arith.addf %14, %6 : vector<1x128xf32>
      %c0_8 = arith.constant 0 : index
      %c0_9 = arith.constant 0 : index
      %c0_10 = arith.constant 0 : index
      %16 = vector.load %arg5[%c0_8, %c0_9, %c0_10] : memref<1x1x128xf32, #tpu.memory_space<vmem>>, vector<1x1x128xf32>
      %17 = vector.shape_cast %16 : vector<1x1x128xf32> to vector<1x128xf32>
      %18 = vector.shape_cast %15 : vector<1x128xf32> to vector<1x1x128xf32>
      tpu.vector_store %arg5[%c0_8, %c0_9, %c0_10], %18 {strides = array<i32>} : memref<1x1x128xf32, #tpu.memory_space<vmem>>, vector<1x1x128xf32>,
    } else {
    }
    return
  }
  func.func @transform_0(%arg0: i32, %arg1: i32, %arg2: i32) -> (i32, i32) {
    %c0_i32 = arith.constant 0 : i32
    %c0_i32_0 = arith.constant 0 : i32
    return %c0_i32, %arg1 : i32, i32
  }
  func.func @transform_1(%arg0: i32, %arg1: i32, %arg2: i32) -> (i32, i32) {
    %c1_i32 = arith.constant 1 : i32
    %0 = arith.muli %arg0, %c1_i32 : i32
    %1 = arith.addi %0, %arg2 : i32
    %c0_i32 = arith.constant 0 : i32
    %c0_i32_0 = arith.constant 0 : i32
    return %1, %c0_i32 : i32, i32
  }
  func.func @transform_2(%arg0: i32, %arg1: i32, %arg2: i32) -> (i32, i32, i32) {
    %c0_i32 = arith.constant 0 : i32
    %c0_i32_0 = arith.constant 0 : i32
    return %arg0, %c0_i32, %arg1 : i32, i32, i32
  }
}

</mosaic_0001>

<bundles_post_ra>
// kernel: tpu_custom_call.1
= control target key start
LH: loop header
LB: loop body
LE: loop exit
PB: predicated region body
PF: predicated region fallthrough
CT: control target
= control target key end

     0   :  { %7 = vsyncpa [#allocation3], 0  ;;  %s1927_s0 = inlined_call_operand.hbm [shape: s32[8,128], index: 0, kind: input, shape index: {}]   ;;  %s1928_s1 = inlined_call_operand.hbm [shape: f32[16,128], index: 1, kind: input, shape index: {}]   ;;  %s1929_s2 = inlined_call_operand.hbm [shape: f32[2,1,128], index: 2, kind: output, shape index: {}]  }
   0x1   :  { %8 = vsyncpa [#allocation6], 0 }
   0x2   :  { %10 = vsyncpa [#allocation6 + $0x1], 0 }
   0x3   :  { %11 = vsyncpa [#allocation4], 0 }
   0x4   :  { %13 = vsyncpa [#allocation4 + $0x1], 0  ;;  %s1231_s9 = smov 0   ;;  %s1233_s10 = smov 0  }
   0x5   :  { %s1235_s11 = smov 0   ;;  %s1237_s12 = smov 0  }
   0x6   :  { %s1239_s13 = smov 0   ;;  %s1241_s14 = smov 0  }
   0x7 LB: > { %s865_s15 = sadd.s32 4294967295, %s1200_s14   ;;  %s866_s16 = sadd.s32 4294967294, %s1200_s14   ;;  %s1200_s14 = sphi %s1241_s14, %s19_s14   ;;  %s1196_s13 = sphi %s1239_s13, %s1955_s13   ;;  %s1192_s12 = sphi %s1237_s12, %s1954_s12   ;;  %s1188_s11 = sphi %s1235_s11, %s1953_s11   ;;  %s1184_s10 = sphi %s1233_s10, %s1952_s10   ;;  %s1180_s9 = sphi %s1231_s9, %s1951_s9  }
   0x8   : > { %p86_p0 = scmp.ne.s32.totalorder %s1184_s10, %s1180_s9  ;;  %p1265_p1 = scmp.eq.s32.totalorder %s865_s15, 0 }
   0x9   : > { %p1269_p2 = scmp.eq.s32.totalorder %s865_s15, 1  ;;  %p118_p3 = scmp.eq.s32.totalorder %s866_s16, 1 }
   0xa   : > { %s1934_s17 = scalar_select %p1265_p1, 1, 0 }
   0xb   : > { %s1935_s18 = scalar_select %p1269_p2, 1, 0 }
   0xc   : > { %p1275_p4 = por %p1265_p1, %p86_p0  ;;  %p867_p5 = scmp.ge.s32.totalorder %s1200_s14, 1 }
   0xd   : > { %p1280_p6 = por %p118_p3, %p86_p0  ;;  %p125_p7 = scmp.lt.s32.totalorder %s1200_s14, 3 }
   0xe   : > { %s1936_s19 = scalar_select %p1275_p4, 1, 0 }
   0xf   : > { %s1937_s20 = scalar_select %p1280_p6, 1, 0 }
  0x10   : > { %p1285_p8 = pnand %p867_p5, %p125_p7  ;;  %s1210_s22 = smov [#allocation2]  }
  0x11   : > { %s140_s23 = sshll.u32 %s1210_s22, 4  ;;  %s38_s25 = sadd.s32 1, %s1196_s13  ;;  %s141_s23 = int_to_ptr.vmem [resolvable:$true] %s140_s23 }
  0x12   : > { %s1938_s21 = scalar_select %p1285_p8, 1, 0 }
  0x13   : > { %p964_p10 = pneg %p1285_p8  ;;  %s73_s26 = sadd.s32 1, %s1188_s11 }
  0x14   : > { %p1300_p12 = scmp.ge.s32.totalorder %s38_s25, 2  ;;  %s1048_s30 = scalar_lea.hbm %s1927_s0, 128 }
  0x15   : > { %p1294_p11 = pnand %p964_p10, %p1265_p1  ;;  %p1049_p13 = scmp.ne.s32.totalorder %s1927_s0, %s1048_s30 }
  0x16   : > { %s1940_s27 = scalar_select %p1300_p12, 1, 0 }
  0x17   : > { %p1050_p0 = pneg %p1294_p11  ;;  %p1055_p7 = scmp.lt.u32.totalorder %s1048_s30, %s1927_s0 }
  0x19   : > { %p1051_p3 = pnand %p1050_p0, %p1049_p13 }
  0x1b   : > { %p1052_p5 = pneg %p1051_p3 }
  0x1d   : > { %p1057_p10 = pnand %p1055_p7, %p1052_p5 }
  0x1f   : > { %1060 = shalt.err (!%p1057_p10)
}
  0x20   : > { %s1061_s7 = scalar_lea.vmem %s141_s23, 128  ;;  %p1069_p1 = scmp.lt.s32.totalorder %s141_s23, %s141_s23 }
  0x21   : > { %p1062_p9 = scmp.ne.s32.totalorder %s141_s23, %s1061_s7  ;;  %p1070_p8 = scmp.lt.s32.totalorder %s1061_s7, %s1061_s7 }
  0x23   : > { %p1064_p6 = pnand %p1062_p9, %p1050_p0  ;;  %p1071_p2 = por %p1070_p8, %p1069_p1 }
  0x25   : > { %p1065_p4 = pneg %p1064_p6 }
  0x27   : > { %p1072_p12 = pnand %p1071_p2, %p1065_p4 }
  0x29   : > { %1075 = shalt.err (!%p1072_p12)
}
  0x2a   : > { %967 = dma.hbm_to_vmem [thread:$0]  (!%p1294_p11), %s1927_s0, 128, %s141_s23, [#allocation3]  }
  0x2b   : > { %p1941_p1 = scmp.ne.s32.totalorder %s1940_s27, 0  ;;  %p80_p2 = scmp.ne.s32.totalorder %s1188_s11, %s1184_s10 }
  0x2c   : > { %p81_p4 = scmp.eq.s32.totalorder %s1200_s14, 0  ;;  %p977_p6 = scmp.lt.s32.totalorder %s1200_s14, 2 }
  0x2d   : > { %s1957_s25 = smov (%p1941_p1, %s38_s25), 0  ;;  %p1942_p12 = scmp.ne.s32.totalorder %s1935_s18, 0 }
  0x2e   : > { %s70_s16 = ssub.s32 %s1196_s13, %s1957_s25  ;;  %p82_p9 = por %p81_p4, %p80_p2 }
  0x2f   : > { %p71_p8 = scmp.eq.s32.totalorder %s70_s16, 0  ;;  %p1332_p13 = por %p1942_p12, %p80_p2 }
  0x30   : > { %s151_s24 = sand.u32 1, %s1188_s11   ;;  %s871_s27 = sshll.u32 %s1196_s13, 7 }
  0x31   : > { %s1340_s28 = scalar_select %p71_p8, %s1188_s11, %s73_s26  }
  0x32   : > { %s870_s23 = sshll.u32 %s151_s24, 3  ;;  %s1346_s3 = scalar_lea.hbm %s1928_s1, %s871_s27 }
  0x33   : > { %s155_s18 = scalar_lea.vmem [#allocation5], %s870_s23  ;;  %p1350_p11 = pnand %p977_p6, %p82_p9 }
  0x34   : > { %s163_s4 = sshll.u32 %s155_s18, 4  ;;  %s152_s26 = scalar_lea.sflag [#allocation6], %s151_s24  ;;  %s1348_s4 = int_to_ptr.vmem [resolvable:$true] %s163_s4 }
  0x35   : > { %s1076_s6 = scalar_lea.hbm %s1346_s3, 128  ;;  %p1078_p3 = pneg %p1350_p11 }
  0x36   : > { %p1077_p0 = scmp.ne.s32.totalorder %s1346_s3, %s1076_s6  ;;  %s1081_s15 = scalar_lea.hbm %s1928_s1, 256 }
  0x37   : > { %p1082_p10 = scmp.lt.u32.totalorder %s1346_s3, %s1928_s1  ;;  %p1083_p1 = scmp.lt.u32.totalorder %s1081_s15, %s1076_s6 }
  0x38   : > { %p1079_p5 = pnand %p1078_p3, %p1077_p0  ;;  %p1085_p4 = scmp.lt.u32.totalorder %s1076_s6, %s1346_s3 }
  0x39   : > { %p1084_p2 = por %p1083_p1, %p1082_p10 }
  0x3a   : > { %p1080_p7 = pneg %p1079_p5 }
  0x3b   : > { %p1086_p6 = por %p1085_p4, %p1084_p2 }
  0x3d   : > { %p1087_p8 = pnand %p1086_p6, %p1080_p7 }
  0x3f   : > { %1090 = shalt.err (!%p1087_p8)
}
  0x40   : > { %s1091_s24 = scalar_lea.vmem %s1348_s4, 128  ;;  %s1211_s27 = smov [#allocation5]  }
  0x41   : > { %p1092_p9 = scmp.ne.s32.totalorder %s1348_s4, %s1091_s24  ;;  %s1096_s29 = sshll.u32 %s1211_s27, 4  ;;  %s1097_s29 = int_to_ptr.vmem [resolvable:$false] %s1096_s29 }
  0x42   : > { %s1098_s30 = scalar_lea.vmem %s1097_s29, 256  ;;  %p1099_p5 = scmp.lt.s32.totalorder %s1348_s4, %s1097_s29 }
  0x43   : > { %p1094_p12 = pnand %p1092_p9, %p1078_p3  ;;  %p1100_p10 = scmp.lt.s32.totalorder %s1098_s30, %s1091_s24 }
  0x45   : > { %p1095_p0 = pneg %p1094_p12  ;;  %p1101_p1 = por %p1100_p10, %p1099_p5 }
  0x47   : > { %p1102_p2 = pnand %p1101_p1, %p1095_p0 }
  0x49   : > { %1105 = shalt.err (!%p1102_p2)
}
  0x4a   : > { %971 = dma.hbm_to_vmem [thread:$0]  (!%p1350_p11), %s1346_s3, 128, %s1348_s4, %s152_s26  }
  0x4b   : > { %p1945_p7 = scmp.ne.s32.totalorder %s1938_s21, 0 }
  0x4c   : > { %p1946_p3 = scmp.ne.s32.totalorder (!%p1945_p7), %s1934_s17, 0 }
  0x4d   : > { %172 = sbr.rel (%p1945_p7) target bundleno = 436 (0x1b4), region = 28 }
  0x54   : > { %1167 = dma.done.wait (%p1946_p3), [#allocation3], 128  }
  0x55   : > { %1169 = vsyncadd (%p1946_p3), [#allocation3], 4294967168  ;;  %s1386_s18 = sand.u32 1, %s1184_s10   ;;  %p1947_p11 = scmp.ne.s32.totalorder %s1936_s19, 0 }
  0x56   : > { %s874_s6 = sshll.u32 %s1386_s18, 3  ;;  %s179_s5 = scalar_lea.sflag [#allocation6], %s1386_s18 }
  0x57   : > { %s1390_s7 = scalar_lea.vmem [#allocation5], %s874_s6 }
  0x58   : > { %1171 = dma.done.wait (%p1947_p11), %s179_s5, 128  }
  0x59   : > { %1173 = vsyncadd (%p1947_p11), %s179_s5, 4294967168  ;;  %s875_s21 = sshll.u32 %s1192_s12, 10  ;;  %v205_v0 = vlaneseq  ;;  %s201_s17 = scalar_lea.vmem [#allocation7], %s1386_s18  ;;  %v1445_v17 = vmov 0.0  }
  0x5a   : > { %s1447_s19 = smov 0  }
  0x5b   : > { %v1397_v1 = vshrl.u32 %v205_v0, 7 }
  0x5d   : > { %v1400_v2 = vadd.s32 8, %v1397_v1  ;;  %v1403_v3 = vadd.s32 16, %v1397_v1  ;;  %v1406_v4 = vadd.s32 24, %v1397_v1  ;;  %v1409_v5 = vadd.s32 32, %v1397_v1 }
  0x5e   : > { %v1412_v6 = vadd.s32 40, %v1397_v1  ;;  %v1415_v7 = vadd.s32 48, %v1397_v1  ;;  %v1418_v8 = vadd.s32 56, %v1397_v1  ;;  %v1421_v9 = vadd.s32 64, %v1397_v1 }
  0x5f   : > { %v1424_v10 = vadd.s32 72, %v1397_v1  ;;  %v1427_v11 = vadd.s32 80, %v1397_v1  ;;  %v1430_v12 = vadd.s32 88, %v1397_v1  ;;  %v1433_v13 = vadd.s32 96, %v1397_v1 }
  0x60   : > { %v1436_v14 = vadd.s32 104, %v1397_v1  ;;  %v1439_v15 = vadd.s32 112, %v1397_v1  ;;  %v1442_v16 = vadd.s32 120, %v1397_v1 }
  0x61 LB: >> { %v1212_v18 = vmov 0.0|0.0   ;;  %v233_v19 = vld [vmem:[#allocation2] sm:$0x1]  ;;  %v288_v20 = vld [vmem:[#allocation2 + $0x1] sm:$0x1]  ;;  %vm1213_vm0 = vmmov 0   ;;  %s229_s26 = scalar_lea.vmem %s1390_s7, %s1208_s19 [#allocation5]  ;;  %s1208_s19 = sphi %s1447_s19, %s227_s19   ;;  %v1204_v17 = vphi %v1445_v17, %v1948_v17  }
  0x62   : >> { %932 = vmatprep.subr.bf16.mxu0 %v1212_v18  ;;  %v342_v21 = vld [vmem:[#allocation2 + $0x2] sm:$0x1]  ;;  %v1214_v22 = vmov 0.0   ;;  %s876_s3 = sshll.u32 %s1208_s19, 7  ;;  %v238_v23 = vsub.s32 0, %v1397_v1  ;;  %s227_s19 = sadd.s32 1, %s1208_s19  }
  0x63   : >> { %929 = vmatprep.mubr.msk.f32.mxu0 %vm1213_vm0, %v1214_v22  ;;  %v396_v24 = vld [vmem:[#allocation2 + $0x3] sm:$0x1]  ;;  %v450_v25 = vld [vmem:[#allocation2 + $0x4] sm:$0x1]  ;;  %s232_s4 = sadd.s32 %s876_s3, %s875_s21  ;;  %v504_v26 = vld [vmem:[#allocation2 + $0x5] sm:$0x1] }
  0x64   : >> { %v558_v27 = vld [vmem:[#allocation2 + $0x6] sm:$0x1]  ;;  %v612_v28 = vld [vmem:[#allocation2 + $0x7] sm:$0x1]  ;;  %v234_v29 = vstv %s232_s4  ;;  %p224_p4 = scmp.ge.s32.totalorder %s227_s19, 8  }
  0x65   : >> { %v235_v30 = vsub.s32 %v233_v19, %v234_v29  ;;  %v289_v31 = vsub.s32 %v288_v20, %v234_v29  ;;  %v343_v32 = vsub.s32 %v342_v21, %v234_v29  ;;  %v397_v33 = vsub.s32 %v396_v24, %v234_v29  ;;  %s877_s8 = sshll.u32 (%p224_p4), %s1192_s12, 4  ;;  %s763_s24 = sshll.u32 (%p224_p4), %s201_s17, 4  ;;  %s764_s24 = int_to_ptr.vmem [resolvable:$true] %s763_s24 }
  0x66   : >> { %v451_v34 = vsub.s32 %v450_v25, %v234_v29  ;;  %v505_v35 = vsub.s32 %v504_v26, %v234_v29  ;;  %v559_v36 = vsub.s32 %v558_v27, %v234_v29  ;;  %v613_v37 = vsub.s32 %v612_v28, %v234_v29  ;;  %s1882_s23 = scalar_lea.hbm (%p224_p4), %s1929_s2, %s877_s8  ;;  %s750_s27 = scalar_lea.sflag (%p224_p4), [#allocation4], %s1386_s18 }
  0x67   : >> { %v1461_v38 = vrot.slane %v235_v30, %v238_v23  ;;  %v1463_v39 = vrot.slane %v289_v31, %v238_v23  ;;  %v1465_v40 = vrot.slane %v343_v32, %v238_v23  ;;  %v1467_v41 = vrot.slane %v397_v33, %v238_v23  ;;  %s1106_s29 = scalar_lea.vmem (%p224_p4), %s764_s24, 16  ;;  %s1215_s30 = smov (%p224_p4), [#allocation7]  }
  0x68   : >> { %v1469_v42 = vrot.slane %v451_v34, %v238_v23  ;;  %v1471_v43 = vrot.slane %v505_v35, %v238_v23  ;;  %v1473_v44 = vrot.slane %v559_v36, %v238_v23  ;;  %v1475_v45 = vrot.slane %v613_v37, %v238_v23  ;;  %p1107_p6 = scmp.ne.s32.totalorder (%p224_p4), %s764_s24, %s1106_s29  ;;  %s1110_s6 = sshll.u32 (%p224_p4), %s1215_s30, 4  ;;  %s1111_s6 = int_to_ptr.vmem [resolvable:$false] %s1110_s6 }
  0x69   : >> { %vm240_vm1 = vcmp.eq.s32.totalorder %v1461_v38, %v1397_v1  ;;  %vm241_vm2 = vcmp.eq.s32.totalorder %v1461_v38, %v1400_v2  ;;  %vm294_vm3 = vcmp.eq.s32.totalorder %v1463_v39, %v1397_v1  ;;  %vm295_vm4 = vcmp.eq.s32.totalorder %v1463_v39, %v1400_v2  ;;  %s1112_s5 = scalar_lea.vmem (%p224_p4), %s1111_s6, 32  ;;  %p1113_p12 = scmp.lt.s32.totalorder (%p224_p4), %s764_s24, %s1111_s6 }
  0x6a   : >> { %v256_v46 = vsel %vm240_vm1, 1.0, %v1214_v22  ;;  %v257_v47 = vsel %vm241_vm2, 1.0, %v1214_v22  ;;  %v310_v48 = vsel %vm294_vm3, 1.0, %v1214_v22  ;;  %v311_v49 = vsel %vm295_vm4, 1.0, %v1214_v22  ;;  %p1108_p8 = pnand (%p224_p4), %p1107_p6, %p1332_p13  ;;  %p1114_p0 = scmp.lt.s32.totalorder (%p224_p4), %s1112_s5, %s1106_s29 }
  0x6b   : >> { %v326_v50 = vadd.f32 %v310_v48, %v256_v46  ;;  %v327_v51 = vadd.f32 %v311_v49, %v257_v47  ;;  %vm348_vm5 = vcmp.eq.s32.totalorder %v1465_v40, %v1397_v1  ;;  %vm349_vm6 = vcmp.eq.s32.totalorder %v1465_v40, %v1400_v2 }
  0x6c   : >> { %v364_v52 = vsel %vm348_vm5, 1.0, %v1214_v22  ;;  %v365_v53 = vsel %vm349_vm6, 1.0, %v1214_v22  ;;  %vm402_vm7 = vcmp.eq.s32.totalorder %v1467_v41, %v1397_v1  ;;  %vm403_vm8 = vcmp.eq.s32.totalorder %v1467_v41, %v1400_v2  ;;  %p1109_p9 = pneg (%p224_p4), %p1108_p8  ;;  %p1115_p5 = por (%p224_p4), %p1114_p0, %p1113_p12 }
  0x6d   : >> { %v380_v54 = vadd.f32 %v364_v52, %v326_v50  ;;  %v381_v55 = vadd.f32 %v365_v53, %v327_v51  ;;  %v418_v56 = vsel %vm402_vm7, 1.0, %v1214_v22  ;;  %v419_v57 = vsel %vm403_vm8, 1.0, %v1214_v22 }
  0x6e   : >> { %vm456_vm9 = vcmp.eq.s32.totalorder %v1469_v42, %v1397_v1  ;;  %vm457_vm10 = vcmp.eq.s32.totalorder %v1469_v42, %v1400_v2  ;;  %vm510_vm11 = vcmp.eq.s32.totalorder %v1471_v43, %v1397_v1  ;;  %vm511_vm12 = vcmp.eq.s32.totalorder %v1471_v43, %v1400_v2  ;;  %p1116_p10 = pnand (%p224_p4), %p1115_p5, %p1109_p9 }
  0x6f   : >> { %v434_v58 = vadd.f32 %v418_v56, %v380_v54  ;;  %v435_v59 = vadd.f32 %v419_v57, %v381_v55  ;;  %v472_v60 = vsel %vm456_vm9, 1.0, %v1214_v22  ;;  %v473_v61 = vsel %vm457_vm10, 1.0, %v1214_v22 }
  0x70   : >> { %v526_v62 = vsel %vm510_vm11, 1.0, %v1214_v22  ;;  %v527_v63 = vsel %vm511_vm12, 1.0, %v1214_v22  ;;  %vm564_vm13 = vcmp.eq.s32.totalorder %v1473_v44, %v1397_v1  ;;  %vm565_vm14 = vcmp.eq.s32.totalorder %v1473_v44, %v1400_v2 }
  0x71   : >> { %v488_v0 = vadd.f32 %v472_v60, %v434_v58  ;;  %v489_v19 = vadd.f32 %v473_v61, %v435_v59  ;;  %v580_v20 = vsel %vm564_vm13, 1.0, %v1214_v22  ;;  %v581_v21 = vsel %vm565_vm14, 1.0, %v1214_v22 }
  0x72   : >> { %vm618_vm15 = vcmp.eq.s32.totalorder %v1475_v45, %v1397_v1  ;;  %vm619_vm0 = vcmp.eq.s32.totalorder %v1475_v45, %v1400_v2  ;;  %vm242_vm1 = vcmp.eq.s32.totalorder %v1461_v38, %v1403_v3  ;;  %vm243_vm2 = vcmp.eq.s32.totalorder %v1461_v38, %v1406_v4 }
  0x73   : >> { %v542_v23 = vadd.f32 %v526_v62, %v488_v0  ;;  %v543_v24 = vadd.f32 %v527_v63, %v489_v19  ;;  %v634_v25 = vsel %vm618_vm15, 1.0, %v1214_v22  ;;  %v635_v26 = vsel %vm619_vm0, 1.0, %v1214_v22 }
  0x74   : >> { %v258_v27 = vsel %vm242_vm1, 1.0, %v1214_v22  ;;  %v259_v28 = vsel %vm243_vm2, 1.0, %v1214_v22  ;;  %vm296_vm3 = vcmp.eq.s32.totalorder %v1463_v39, %v1403_v3  ;;  %vm297_vm4 = vcmp.eq.s32.totalorder %v1463_v39, %v1406_v4 }
  0x75   : >> { %v596_v29 = vadd.f32 %v580_v20, %v542_v23  ;;  %v597_v30 = vadd.f32 %v581_v21, %v543_v24  ;;  %v312_v31 = vsel %vm296_vm3, 1.0, %v1214_v22  ;;  %v313_v32 = vsel %vm297_vm4, 1.0, %v1214_v22 }
  0x76   : >> { %v328_v33 = vadd.f32 %v312_v31, %v258_v27  ;;  %v329_v34 = vadd.f32 %v313_v32, %v259_v28  ;;  %vm350_vm5 = vcmp.eq.s32.totalorder %v1465_v40, %v1403_v3  ;;  %vm351_vm6 = vcmp.eq.s32.totalorder %v1465_v40, %v1406_v4 }
  0x77   : >> { %v650_v35 = vadd.f32 %v634_v25, %v596_v29  ;;  %v651_v36 = vadd.f32 %v635_v26, %v597_v30  ;;  %v366_v37 = vsel %vm350_vm5, 1.0, %v1214_v22  ;;  %v367_v46 = vsel %vm351_vm6, 1.0, %v1214_v22 }
  0x78   : >> { %v382_v47 = vadd.f32 %v366_v37, %v328_v33  ;;  %v383_v48 = vadd.f32 %v367_v46, %v329_v34  ;;  %vm404_vm7 = vcmp.eq.s32.totalorder %v1467_v41, %v1403_v3  ;;  %vm405_vm8 = vcmp.eq.s32.totalorder %v1467_v41, %v1406_v4 }
  0x79   : >> { %v933_v49 = vpack.c.bf16 %v651_v36, %v650_v35  ;;  %v420_v50 = vsel %vm404_vm7, 1.0, %v1214_v22  ;;  %v421_v51 = vsel %vm405_vm8, 1.0, %v1214_v22  ;;  %vm458_vm9 = vcmp.eq.s32.totalorder %v1469_v42, %v1403_v3 }
  0x7a   : >> { %v436_v52 = vadd.f32 %v420_v50, %v382_v47  ;;  %v437_v53 = vadd.f32 %v421_v51, %v383_v48  ;;  %vm459_vm10 = vcmp.eq.s32.totalorder %v1469_v42, %v1406_v4  ;;  %v474_v54 = vsel %vm458_vm9, 1.0, %v1214_v22 }
  0x7b   : >> { %934 = vmatpush3.bf16.msra.mxu0 %v933_v49  ;;  %v475_v55 = vsel %vm459_vm10, 1.0, %v1214_v22  ;;  %vm512_vm11 = vcmp.eq.s32.totalorder %v1471_v43, %v1403_v3  ;;  %vm513_vm12 = vcmp.eq.s32.totalorder %v1471_v43, %v1406_v4  ;;  %vm566_vm13 = vcmp.eq.s32.totalorder %v1473_v44, %v1403_v3 }
  0x7c   : >> { %935 = vmatprep.subr.bf16.mxu0 %v1212_v18  ;;  %v490_v56 = vadd.f32 %v474_v54, %v436_v52  ;;  %v491_v57 = vadd.f32 %v475_v55, %v437_v53  ;;  %v528_v58 = vsel %vm512_vm11, 1.0, %v1214_v22  ;;  %v529_v59 = vsel %vm513_vm12, 1.0, %v1214_v22 }
  0x7d   : >> { %vm567_vm14 = vcmp.eq.s32.totalorder %v1473_v44, %v1406_v4  ;;  %v582_v60 = vsel %vm566_vm13, 1.0, %v1214_v22  ;;  %vm620_vm15 = vcmp.eq.s32.totalorder %v1475_v45, %v1403_v3  ;;  %vm621_vm0 = vcmp.eq.s32.totalorder %v1475_v45, %v1406_v4 }
  0x7e   : >> { %v544_v61 = vadd.f32 %v528_v58, %v490_v56  ;;  %v545_v62 = vadd.f32 %v529_v59, %v491_v57  ;;  %v583_v63 = vsel %vm567_vm14, 1.0, %v1214_v22  ;;  %v636_v0 = vsel %vm620_vm15, 1.0, %v1214_v22 }
  0x7f   : >> { %v637_v19 = vsel %vm621_vm0, 1.0, %v1214_v22  ;;  %vm244_vm1 = vcmp.eq.s32.totalorder %v1461_v38, %v1409_v5  ;;  %vm245_vm2 = vcmp.eq.s32.totalorder %v1461_v38, %v1412_v6  ;;  %vm298_vm3 = vcmp.eq.s32.totalorder %v1463_v39, %v1409_v5 }
  0x80   : >> { %v598_v20 = vadd.f32 %v582_v60, %v544_v61  ;;  %v599_v21 = vadd.f32 %v583_v63, %v545_v62  ;;  %v260_v23 = vsel %vm244_vm1, 1.0, %v1214_v22  ;;  %v261_v24 = vsel %vm245_vm2, 1.0, %v1214_v22 }
  0x81   : >> { %vm299_vm4 = vcmp.eq.s32.totalorder %v1463_v39, %v1412_v6  ;;  %v314_v25 = vsel %vm298_vm3, 1.0, %v1214_v22  ;;  %vm352_vm5 = vcmp.eq.s32.totalorder %v1465_v40, %v1409_v5  ;;  %vm353_vm6 = vcmp.eq.s32.totalorder %v1465_v40, %v1412_v6 }
  0x82   : >> { %v652_v26 = vadd.f32 %v636_v0, %v598_v20  ;;  %v653_v27 = vadd.f32 %v637_v19, %v599_v21  ;;  %v315_v28 = vsel %vm299_vm4, 1.0, %v1214_v22  ;;  %v330_v29 = vadd.f32 %v314_v25, %v260_v23 }
  0x83   : >> { %v331_v30 = vadd.f32 %v315_v28, %v261_v24  ;;  %v368_v31 = vsel %vm352_vm5, 1.0, %v1214_v22  ;;  %v369_v32 = vsel %vm353_vm6, 1.0, %v1214_v22  ;;  %vm406_vm7 = vcmp.eq.s32.totalorder %v1467_v41, %v1409_v5 }
  0x84   : >> { %v936_v33 = vpack.c.bf16 %v653_v27, %v652_v26  ;;  %v384_v34 = vadd.f32 %v368_v31, %v330_v29  ;;  %vm407_vm8 = vcmp.eq.s32.totalorder %v1467_v41, %v1412_v6  ;;  %v422_v35 = vsel %vm406_vm7, 1.0, %v1214_v22 }
  0x85   : >> { %v385_v36 = vadd.f32 %v369_v32, %v331_v30  ;;  %v423_v37 = vsel %vm407_vm8, 1.0, %v1214_v22  ;;  %vm460_vm9 = vcmp.eq.s32.totalorder %v1469_v42, %v1409_v5  ;;  %vm461_vm10 = vcmp.eq.s32.totalorder %v1469_v42, %v1412_v6 }
  0x86   : >> { %937 = vmatpush3.bf16.msra.mxu0 %v936_v33  ;;  %v438_v46 = vadd.f32 %v422_v35, %v384_v34  ;;  %v476_v47 = vsel %vm460_vm9, 1.0, %v1214_v22  ;;  %v477_v48 = vsel %vm461_vm10, 1.0, %v1214_v22  ;;  %vm514_vm11 = vcmp.eq.s32.totalorder %v1471_v43, %v1409_v5 }
  0x87   : >> { %938 = vmatprep.subr.bf16.mxu0 %v1212_v18  ;;  %v439_v49 = vadd.f32 %v423_v37, %v385_v36  ;;  %vm515_vm12 = vcmp.eq.s32.totalorder %v1471_v43, %v1412_v6  ;;  %v530_v50 = vsel %vm514_vm11, 1.0, %v1214_v22  ;;  %vm568_vm13 = vcmp.eq.s32.totalorder %v1473_v44, %v1409_v5 }
  0x88   : >> { %v492_v51 = vadd.f32 %v476_v47, %v438_v46  ;;  %v531_v52 = vsel %vm515_vm12, 1.0, %v1214_v22  ;;  %vm569_vm14 = vcmp.eq.s32.totalorder %v1473_v44, %v1412_v6  ;;  %v584_v53 = vsel %vm568_vm13, 1.0, %v1214_v22 }
  0x89   : >> { %v493_v54 = vadd.f32 %v477_v48, %v439_v49  ;;  %v585_v55 = vsel %vm569_vm14, 1.0, %v1214_v22  ;;  %vm622_vm15 = vcmp.eq.s32.totalorder %v1475_v45, %v1409_v5  ;;  %vm623_vm0 = vcmp.eq.s32.totalorder %v1475_v45, %v1412_v6 }
  0x8a   : >> { %v546_v56 = vadd.f32 %v530_v50, %v492_v51  ;;  %v638_v57 = vsel %vm622_vm15, 1.0, %v1214_v22  ;;  %v639_v58 = vsel %vm623_vm0, 1.0, %v1214_v22  ;;  %vm246_vm1 = vcmp.eq.s32.totalorder %v1461_v38, %v1415_v7 }
  0x8b   : >> { %v547_v59 = vadd.f32 %v531_v52, %v493_v54  ;;  %vm247_vm2 = vcmp.eq.s32.totalorder %v1461_v38, %v1418_v8  ;;  %v262_v60 = vsel %vm246_vm1, 1.0, %v1214_v22  ;;  %vm300_vm3 = vcmp.eq.s32.totalorder %v1463_v39, %v1415_v7 }
  0x8c   : >> { %v600_v61 = vadd.f32 %v584_v53, %v546_v56  ;;  %v263_v62 = vsel %vm247_vm2, 1.0, %v1214_v22  ;;  %vm301_vm4 = vcmp.eq.s32.totalorder %v1463_v39, %v1418_v8  ;;  %v316_v63 = vsel %vm300_vm3, 1.0, %v1214_v22 }
  0x8d   : >> { %v601_v0 = vadd.f32 %v585_v55, %v547_v59  ;;  %v317_v19 = vsel %vm301_vm4, 1.0, %v1214_v22  ;;  %v332_v20 = vadd.f32 %v316_v63, %v262_v60  ;;  %vm354_vm5 = vcmp.eq.s32.totalorder %v1465_v40, %v1415_v7 }
  0x8e   : >> { %v654_v21 = vadd.f32 %v638_v57, %v600_v61  ;;  %v333_v23 = vadd.f32 %v317_v19, %v263_v62  ;;  %vm355_vm6 = vcmp.eq.s32.totalorder %v1465_v40, %v1418_v8  ;;  %v370_v24 = vsel %vm354_vm5, 1.0, %v1214_v22 }
  0x8f   : >> { %v655_v25 = vadd.f32 %v639_v58, %v601_v0  ;;  %v371_v26 = vsel %vm355_vm6, 1.0, %v1214_v22  ;;  %v386_v27 = vadd.f32 %v370_v24, %v332_v20  ;;  %vm408_vm7 = vcmp.eq.s32.totalorder %v1467_v41, %v1415_v7 }
  0x90   : >> { %v387_v28 = vadd.f32 %v371_v26, %v333_v23  ;;  %vm409_vm8 = vcmp.eq.s32.totalorder %v1467_v41, %v1418_v8  ;;  %v424_v29 = vsel %vm408_vm7, 1.0, %v1214_v22  ;;  %vm462_vm9 = vcmp.eq.s32.totalorder %v1469_v42, %v1415_v7 }
  0x91   : >> { %v939_v30 = vpack.c.bf16 %v655_v25, %v654_v21  ;;  %v425_v31 = vsel %vm409_vm8, 1.0, %v1214_v22  ;;  %v440_v32 = vadd.f32 %v424_v29, %v386_v27  ;;  %vm463_vm10 = vcmp.eq.s32.totalorder %v1469_v42, %v1418_v8 }
  0x92   : >> { %v441_v33 = vadd.f32 %v425_v31, %v387_v28  ;;  %v478_v34 = vsel %vm462_vm9, 1.0, %v1214_v22  ;;  %v479_v35 = vsel %vm463_vm10, 1.0, %v1214_v22  ;;  %vm516_vm11 = vcmp.eq.s32.totalorder %v1471_v43, %v1415_v7 }
  0x93   : >> { %940 = vmatpush3.bf16.msra.mxu0 %v939_v30  ;;  %v494_v36 = vadd.f32 %v478_v34, %v440_v32  ;;  %vm517_vm12 = vcmp.eq.s32.totalorder %v1471_v43, %v1418_v8  ;;  %v532_v37 = vsel %vm516_vm11, 1.0, %v1214_v22  ;;  %vm570_vm13 = vcmp.eq.s32.totalorder %v1473_v44, %v1415_v7 }
  0x94   : >> { %941 = vmatprep.subr.bf16.mxu0 %v1212_v18  ;;  %v495_v46 = vadd.f32 %v479_v35, %v441_v33  ;;  %v533_v47 = vsel %vm517_vm12, 1.0, %v1214_v22  ;;  %vm571_vm14 = vcmp.eq.s32.totalorder %v1473_v44, %v1418_v8  ;;  %v586_v48 = vsel %vm570_vm13, 1.0, %v1214_v22 }
  0x95   : >> { %v548_v49 = vadd.f32 %v532_v37, %v494_v36  ;;  %v587_v50 = vsel %vm571_vm14, 1.0, %v1214_v22  ;;  %vm624_vm15 = vcmp.eq.s32.totalorder %v1475_v45, %v1415_v7  ;;  %vm625_vm0 = vcmp.eq.s32.totalorder %v1475_v45, %v1418_v8 }
  0x96   : >> { %v549_v51 = vadd.f32 %v533_v47, %v495_v46  ;;  %v640_v52 = vsel %vm624_vm15, 1.0, %v1214_v22  ;;  %v641_v53 = vsel %vm625_vm0, 1.0, %v1214_v22  ;;  %vm248_vm1 = vcmp.eq.s32.totalorder %v1461_v38, %v1421_v9 }
  0x97   : >> { %v602_v54 = vadd.f32 %v586_v48, %v548_v49  ;;  %vm249_vm2 = vcmp.eq.s32.totalorder %v1461_v38, %v1424_v10  ;;  %v264_v55 = vsel %vm248_vm1, 1.0, %v1214_v22  ;;  %vm302_vm3 = vcmp.eq.s32.totalorder %v1463_v39, %v1421_v9 }
  0x98   : >> { %v603_v56 = vadd.f32 %v587_v50, %v549_v51  ;;  %v265_v57 = vsel %vm249_vm2, 1.0, %v1214_v22  ;;  %vm303_vm4 = vcmp.eq.s32.totalorder %v1463_v39, %v1424_v10  ;;  %v318_v58 = vsel %vm302_vm3, 1.0, %v1214_v22 }
  0x99   : >> { %v656_v59 = vadd.f32 %v640_v52, %v602_v54  ;;  %v319_v60 = vsel %vm303_vm4, 1.0, %v1214_v22  ;;  %v334_v61 = vadd.f32 %v318_v58, %v264_v55  ;;  %vm356_vm5 = vcmp.eq.s32.totalorder %v1465_v40, %v1421_v9 }
  0x9a   : >> { %v657_v62 = vadd.f32 %v641_v53, %v603_v56  ;;  %v335_v63 = vadd.f32 %v319_v60, %v265_v57  ;;  %vm357_vm6 = vcmp.eq.s32.totalorder %v1465_v40, %v1424_v10  ;;  %v372_v0 = vsel %vm356_vm5, 1.0, %v1214_v22 }
  0x9b   : >> { %v373_v19 = vsel %vm357_vm6, 1.0, %v1214_v22  ;;  %v388_v20 = vadd.f32 %v372_v0, %v334_v61  ;;  %vm410_vm7 = vcmp.eq.s32.totalorder %v1467_v41, %v1421_v9  ;;  %vm411_vm8 = vcmp.eq.s32.totalorder %v1467_v41, %v1424_v10 }
  0x9c   : >> { %v942_v21 = vpack.c.bf16 %v657_v62, %v656_v59  ;;  %v389_v23 = vadd.f32 %v373_v19, %v335_v63  ;;  %v426_v24 = vsel %vm410_vm7, 1.0, %v1214_v22  ;;  %v427_v25 = vsel %vm411_vm8, 1.0, %v1214_v22 }
  0x9d   : >> { %v442_v26 = vadd.f32 %v426_v24, %v388_v20  ;;  %vm464_vm9 = vcmp.eq.s32.totalorder %v1469_v42, %v1421_v9  ;;  %vm465_vm10 = vcmp.eq.s32.totalorder %v1469_v42, %v1424_v10  ;;  %vm518_vm11 = vcmp.eq.s32.totalorder %v1471_v43, %v1421_v9 }
  0x9e   : >> { %943 = vmatpush3.bf16.msra.mxu0 %v942_v21  ;;  %v443_v27 = vadd.f32 %v427_v25, %v389_v23  ;;  %v480_v28 = vsel %vm464_vm9, 1.0, %v1214_v22  ;;  %v481_v29 = vsel %vm465_vm10, 1.0, %v1214_v22  ;;  %vm519_vm12 = vcmp.eq.s32.totalorder %v1471_v43, %v1424_v10 }
  0x9f   : >> { %944 = vmatprep.subr.bf16.mxu0 %v1212_v18  ;;  %v496_v30 = vadd.f32 %v480_v28, %v442_v26  ;;  %v534_v31 = vsel %vm518_vm11, 1.0, %v1214_v22  ;;  %v535_v32 = vsel %vm519_vm12, 1.0, %v1214_v22  ;;  %vm572_vm13 = vcmp.eq.s32.totalorder %v1473_v44, %v1421_v9 }
  0xa0   : >> { %v497_v33 = vadd.f32 %v481_v29, %v443_v27  ;;  %vm573_vm14 = vcmp.eq.s32.totalorder %v1473_v44, %v1424_v10  ;;  %v588_v34 = vsel %vm572_vm13, 1.0, %v1214_v22  ;;  %vm626_vm15 = vcmp.eq.s32.totalorder %v1475_v45, %v1421_v9 }
  0xa1   : >> { %v550_v35 = vadd.f32 %v534_v31, %v496_v30  ;;  %v589_v36 = vsel %vm573_vm14, 1.0, %v1214_v22  ;;  %vm627_vm0 = vcmp.eq.s32.totalorder %v1475_v45, %v1424_v10  ;;  %v642_v37 = vsel %vm626_vm15, 1.0, %v1214_v22 }
  0xa2   : >> { %v551_v46 = vadd.f32 %v535_v32, %v497_v33  ;;  %v643_v47 = vsel %vm627_vm0, 1.0, %v1214_v22  ;;  %vm250_vm1 = vcmp.eq.s32.totalorder %v1461_v38, %v1427_v11  ;;  %vm251_vm2 = vcmp.eq.s32.totalorder %v1461_v38, %v1430_v12 }
  0xa3   : >> { %v604_v48 = vadd.f32 %v588_v34, %v550_v35  ;;  %v266_v49 = vsel %vm250_vm1, 1.0, %v1214_v22  ;;  %v267_v50 = vsel %vm251_vm2, 1.0, %v1214_v22  ;;  %vm304_vm3 = vcmp.eq.s32.totalorder %v1463_v39, %v1427_v11 }
  0xa4   : >> { %v605_v51 = vadd.f32 %v589_v36, %v551_v46  ;;  %vm305_vm4 = vcmp.eq.s32.totalorder %v1463_v39, %v1430_v12  ;;  %v320_v52 = vsel %vm304_vm3, 1.0, %v1214_v22  ;;  %vm358_vm5 = vcmp.eq.s32.totalorder %v1465_v40, %v1427_v11 }
  0xa5   : >> { %v658_v53 = vadd.f32 %v642_v37, %v604_v48  ;;  %v321_v54 = vsel %vm305_vm4, 1.0, %v1214_v22  ;;  %v336_v55 = vadd.f32 %v320_v52, %v266_v49  ;;  %vm359_vm6 = vcmp.eq.s32.totalorder %v1465_v40, %v1430_v12 }
  0xa6   : >> { %v659_v56 = vadd.f32 %v643_v47, %v605_v51  ;;  %v337_v57 = vadd.f32 %v321_v54, %v267_v50  ;;  %v374_v58 = vsel %vm358_vm5, 1.0, %v1214_v22  ;;  %v375_v59 = vsel %vm359_vm6, 1.0, %v1214_v22 }
  0xa7   : >> { %v390_v60 = vadd.f32 %v374_v58, %v336_v55  ;;  %vm412_vm7 = vcmp.eq.s32.totalorder %v1467_v41, %v1427_v11  ;;  %vm413_vm8 = vcmp.eq.s32.totalorder %v1467_v41, %v1430_v12  ;;  %vm466_vm9 = vcmp.eq.s32.totalorder %v1469_v42, %v1427_v11 }
  0xa8   : >> { %v945_v61 = vpack.c.bf16 %v659_v56, %v658_v53  ;;  %v391_v62 = vadd.f32 %v375_v59, %v337_v57  ;;  %v428_v63 = vsel %vm412_vm7, 1.0, %v1214_v22  ;;  %v429_v0 = vsel %vm413_vm8, 1.0, %v1214_v22 }
  0xa9   : >> { %v444_v19 = vadd.f32 %v428_v63, %v390_v60  ;;  %vm467_vm10 = vcmp.eq.s32.totalorder %v1469_v42, %v1430_v12  ;;  %v482_v20 = vsel %vm466_vm9, 1.0, %v1214_v22  ;;  %vm520_vm11 = vcmp.eq.s32.totalorder %v1471_v43, %v1427_v11 }
  0xaa   : >> { %946 = vmatpush3.bf16.msra.mxu0 %v945_v61  ;;  %v445_v21 = vadd.f32 %v429_v0, %v391_v62  ;;  %v483_v23 = vsel %vm467_vm10, 1.0, %v1214_v22  ;;  %vm521_vm12 = vcmp.eq.s32.totalorder %v1471_v43, %v1430_v12  ;;  %v536_v24 = vsel %vm520_vm11, 1.0, %v1214_v22 }
  0xab   : >> { %947 = vmatprep.subr.bf16.mxu0 %v1212_v18  ;;  %v498_v25 = vadd.f32 %v482_v20, %v444_v19  ;;  %v537_v26 = vsel %vm521_vm12, 1.0, %v1214_v22  ;;  %vm574_vm13 = vcmp.eq.s32.totalorder %v1473_v44, %v1427_v11  ;;  %vm575_vm14 = vcmp.eq.s32.totalorder %v1473_v44, %v1430_v12 }
  0xac   : >> { %v499_v27 = vadd.f32 %v483_v23, %v445_v21  ;;  %v590_v28 = vsel %vm574_vm13, 1.0, %v1214_v22  ;;  %v591_v29 = vsel %vm575_vm14, 1.0, %v1214_v22  ;;  %vm628_vm15 = vcmp.eq.s32.totalorder %v1475_v45, %v1427_v11 }
  0xad   : >> { %v552_v30 = vadd.f32 %v536_v24, %v498_v25  ;;  %vm629_vm0 = vcmp.eq.s32.totalorder %v1475_v45, %v1430_v12  ;;  %v644_v31 = vsel %vm628_vm15, 1.0, %v1214_v22  ;;  %vm252_vm1 = vcmp.eq.s32.totalorder %v1461_v38, %v1433_v13 }
  0xae   : >> { %v553_v32 = vadd.f32 %v537_v26, %v499_v27  ;;  %v645_v33 = vsel %vm629_vm0, 1.0, %v1214_v22  ;;  %vm253_vm2 = vcmp.eq.s32.totalorder %v1461_v38, %v1436_v14  ;;  %v268_v34 = vsel %vm252_vm1, 1.0, %v1214_v22 }
  0xaf   : >> { %v606_v35 = vadd.f32 %v590_v28, %v552_v30  ;;  %v269_v36 = vsel %vm253_vm2, 1.0, %v1214_v22  ;;  %vm306_vm3 = vcmp.eq.s32.totalorder %v1463_v39, %v1433_v13  ;;  %vm307_vm4 = vcmp.eq.s32.totalorder %v1463_v39, %v1436_v14 }
  0xb0   : >> { %v607_v37 = vadd.f32 %v591_v29, %v553_v32  ;;  %v322_v46 = vsel %vm306_vm3, 1.0, %v1214_v22  ;;  %v323_v47 = vsel %vm307_vm4, 1.0, %v1214_v22  ;;  %vm360_vm5 = vcmp.eq.s32.totalorder %v1465_v40, %v1433_v13 }
  0xb1   : >> { %v660_v48 = vadd.f32 %v644_v31, %v606_v35  ;;  %v338_v49 = vadd.f32 %v322_v46, %v268_v34  ;;  %v339_v50 = vadd.f32 %v323_v47, %v269_v36  ;;  %vm361_vm6 = vcmp.eq.s32.totalorder %v1465_v40, %v1436_v14 }
  0xb2   : >> { %v661_v51 = vadd.f32 %v645_v33, %v607_v37  ;;  %v376_v52 = vsel %vm360_vm5, 1.0, %v1214_v22  ;;  %v377_v53 = vsel %vm361_vm6, 1.0, %v1214_v22  ;;  %vm414_vm7 = vcmp.eq.s32.totalorder %v1467_v41, %v1433_v13 }
  0xb3   : >> { %v392_v54 = vadd.f32 %v376_v52, %v338_v49  ;;  %v393_v55 = vadd.f32 %v377_v53, %v339_v50  ;;  %vm415_vm8 = vcmp.eq.s32.totalorder %v1467_v41, %v1436_v14  ;;  %v430_v56 = vsel %vm414_vm7, 1.0, %v1214_v22 }
  0xb4   : >> { %v948_v57 = vpack.c.bf16 %v661_v51, %v660_v48  ;;  %v431_v58 = vsel %vm415_vm8, 1.0, %v1214_v22  ;;  %vm468_vm9 = vcmp.eq.s32.totalorder %v1469_v42, %v1433_v13  ;;  %vm469_vm10 = vcmp.eq.s32.totalorder %v1469_v42, %v1436_v14 }
  0xb5   : >> { %v446_v59 = vadd.f32 %v430_v56, %v392_v54  ;;  %v447_v60 = vadd.f32 %v431_v58, %v393_v55  ;;  %v484_v61 = vsel %vm468_vm9, 1.0, %v1214_v22  ;;  %v485_v62 = vsel %vm469_vm10, 1.0, %v1214_v22 }
  0xb6   : >> { %949 = vmatpush3.bf16.msra.mxu0 %v948_v57  ;;  %vm522_vm11 = vcmp.eq.s32.totalorder %v1471_v43, %v1433_v13  ;;  %vm523_vm12 = vcmp.eq.s32.totalorder %v1471_v43, %v1436_v14  ;;  %vm576_vm13 = vcmp.eq.s32.totalorder %v1473_v44, %v1433_v13  ;;  %vm577_vm14 = vcmp.eq.s32.totalorder %v1473_v44, %v1436_v14 }
  0xb7   : >> { %950 = vmatprep.subr.bf16.mxu0 %v1212_v18  ;;  %v500_v63 = vadd.f32 %v484_v61, %v446_v59  ;;  %v501_v0 = vadd.f32 %v485_v62, %v447_v60  ;;  %v538_v19 = vsel %vm522_vm11, 1.0, %v1214_v22  ;;  %v539_v20 = vsel %vm523_vm12, 1.0, %v1214_v22 }
  0xb8   : >> { %v592_v21 = vsel %vm576_vm13, 1.0, %v1214_v22  ;;  %v593_v23 = vsel %vm577_vm14, 1.0, %v1214_v22  ;;  %vm630_vm15 = vcmp.eq.s32.totalorder %v1475_v45, %v1433_v13  ;;  %vm631_vm0 = vcmp.eq.s32.totalorder %v1475_v45, %v1436_v14 }
  0xb9   : >> { %v554_v24 = vadd.f32 %v538_v19, %v500_v63  ;;  %v555_v25 = vadd.f32 %v539_v20, %v501_v0  ;;  %v646_v26 = vsel %vm630_vm15, 1.0, %v1214_v22  ;;  %v647_v27 = vsel %vm631_vm0, 1.0, %v1214_v22  ;;  %v230_v0 = vld [vmem:[%s229_s26] sm:$0x1] }
  0xba   : >> { %vm254_vm1 = vcmp.eq.s32.totalorder %v1461_v38, %v1439_v15  ;;  %vm255_vm2 = vcmp.eq.s32.totalorder %v1461_v38, %v1442_v16  ;;  %vm308_vm3 = vcmp.eq.s32.totalorder %v1463_v39, %v1439_v15  ;;  %vm309_vm4 = vcmp.eq.s32.totalorder %v1463_v39, %v1442_v16 }
  0xbb   : >> { %v608_v28 = vadd.f32 %v592_v21, %v554_v24  ;;  %v609_v29 = vadd.f32 %v593_v23, %v555_v25  ;;  %v270_v30 = vsel %vm254_vm1, 1.0, %v1214_v22  ;;  %v271_v31 = vsel %vm255_vm2, 1.0, %v1214_v22 }
  0xbc   : >> { %v324_v32 = vsel %vm308_vm3, 1.0, %v1214_v22  ;;  %v325_v33 = vsel %vm309_vm4, 1.0, %v1214_v22  ;;  %vm362_vm5 = vcmp.eq.s32.totalorder %v1465_v40, %v1439_v15  ;;  %vm363_vm6 = vcmp.eq.s32.totalorder %v1465_v40, %v1442_v16 }
  0xbd   : >> { %v662_v38 = vadd.f32 %v646_v26, %v608_v28  ;;  %v663_v34 = vadd.f32 %v647_v27, %v609_v29  ;;  %v340_v35 = vadd.f32 %v324_v32, %v270_v30  ;;  %v341_v39 = vadd.f32 %v325_v33, %v271_v31 }
  0xbe   : >> { %v378_v36 = vsel %vm362_vm5, 1.0, %v1214_v22  ;;  %v379_v37 = vsel %vm363_vm6, 1.0, %v1214_v22  ;;  %vm416_vm7 = vcmp.eq.s32.totalorder %v1467_v41, %v1439_v15  ;;  %vm417_vm8 = vcmp.eq.s32.totalorder %v1467_v41, %v1442_v16 }
  0xbf   : >> { %v951_v46 = vpack.c.bf16 %v663_v34, %v662_v38  ;;  %v394_v47 = vadd.f32 %v378_v36, %v340_v35  ;;  %v395_v48 = vadd.f32 %v379_v37, %v341_v39  ;;  %v432_v49 = vsel %vm416_vm7, 1.0, %v1214_v22 }
  0xc0   : >> { %v433_v40 = vsel %vm417_vm8, 1.0, %v1214_v22  ;;  %vm470_vm9 = vcmp.eq.s32.totalorder %v1469_v42, %v1439_v15  ;;  %vm471_vm10 = vcmp.eq.s32.totalorder %v1469_v42, %v1442_v16  ;;  %vm524_vm11 = vcmp.eq.s32.totalorder %v1471_v43, %v1439_v15 }
  0xc1   : >> { %952 = vmatpush3.bf16.msra.mxu0 %v951_v46  ;;  %v448_v50 = vadd.f32 %v432_v49, %v394_v47  ;;  %v449_v51 = vadd.f32 %v433_v40, %v395_v48  ;;  %v486_v41 = vsel %vm470_vm9, 1.0, %v1214_v22  ;;  %v487_v52 = vsel %vm471_vm10, 1.0, %v1214_v22 }
  0xc2   : >> { %953 = vmatprep.subr.bf16.mxu0 %v1212_v18  ;;  %vm525_vm12 = vcmp.eq.s32.totalorder %v1471_v43, %v1442_v16  ;;  %v540_v53 = vsel %vm524_vm11, 1.0, %v1214_v22  ;;  %vm578_vm13 = vcmp.eq.s32.totalorder %v1473_v44, %v1439_v15  ;;  %vm579_vm14 = vcmp.eq.s32.totalorder %v1473_v44, %v1442_v16 }
  0xc3   : >> { %v502_v42 = vadd.f32 %v486_v41, %v448_v50  ;;  %v503_v54 = vadd.f32 %v487_v52, %v449_v51  ;;  %v541_v55 = vsel %vm525_vm12, 1.0, %v1214_v22  ;;  %v594_v56 = vsel %vm578_vm13, 1.0, %v1214_v22 }
  0xc4   : >> { %v595_v18 = vsel %vm579_vm14, 1.0, %v1214_v22  ;;  %vm632_vm15 = vcmp.eq.s32.totalorder %v1475_v45, %v1439_v15  ;;  %vm633_vm0 = vcmp.eq.s32.totalorder %v1475_v45, %v1442_v16 }
  0xc5   : >> { %v556_v43 = vadd.f32 %v540_v53, %v502_v42  ;;  %v557_v57 = vadd.f32 %v541_v55, %v503_v54  ;;  %v648_v44 = vsel %vm632_vm15, 1.0, %v1214_v22  ;;  %v649_v58 = vsel %vm633_vm0, 1.0, %v1214_v22 }
  0xc7   : >> { %v610_v59 = vadd.f32 %v594_v56, %v556_v43  ;;  %v611_v60 = vadd.f32 %v595_v18, %v557_v57 }
  0xc9   : >> { %v664_v61 = vadd.f32 %v648_v44, %v610_v59  ;;  %v665_v62 = vadd.f32 %v649_v58, %v611_v60 }
  0xcb   : >> { %v954_v63 = vpack.c.bf16 %v665_v62, %v664_v61 }
  0xcd   : >> { %955 = vmatpush3.bf16.msra.mxu0 %v954_v63 }
  0xd0   : >> { %930 = vmatmul.mubr.f32.vlgmr.msra.gmra.mrb[0].mxu0 %v230_v0 }
 0x1a0   : > { %226 = sbr.rel (!%p224_p4) target bundleno = 97 (0x61), region = 95 }
 0x1a3   : >> { %v732_v19 = vpop.f32.mrb[0].mxu0 }
 0x1a4   : >> { %v736_v20 = vadd.f32 %v1204_v17, %v732_v19   ;;  %v931_v21 = vpop.f32.mrb[1].mxu0 }
 0x1a6   : >> { %v1948_v17 = vmov %v736_v20  ;;  %741 = vst [vmem:[%s201_s17] sm:$0x1] (%p224_p4), %v736_v20 }
 0x1a7   : > { %1119 = shalt.err (!%p1116_p10)
}
 0x1a8   : > { %s1120_s12 = scalar_lea.hbm %s1882_s23, 16  ;;  %s1124_s21 = scalar_lea.hbm %s1929_s2, 32 }
 0x1a9   : > { %p1121_p1 = scmp.ne.s32.totalorder %s1882_s23, %s1120_s12  ;;  %p1125_p3 = scmp.lt.u32.totalorder %s1882_s23, %s1929_s2 }
 0x1aa   : > { %p1126_p11 = scmp.lt.u32.totalorder %s1124_s21, %s1120_s12  ;;  %p1128_p6 = scmp.lt.u32.totalorder %s1120_s12, %s1882_s23 }
 0x1ab   : > { %p1122_p2 = pnand %p1121_p1, %p1332_p13 }
 0x1ac   : > { %p1127_p4 = por %p1126_p11, %p1125_p3 }
 0x1ad   : > { %p1123_p7 = pneg %p1122_p2 }
 0x1ae   : > { %p1129_p8 = por %p1128_p6, %p1127_p4 }
 0x1b0   : > { %p1130_p9 = pnand %p1129_p8, %p1123_p7 }
 0x1b2   : > { %1133 = shalt.err (!%p1130_p9)
}
 0x1b3   : > { %962 = dma.vmem_to_hbm [thread:$0]  (%p1332_p13), %s764_s24, 16, %s1882_s23, %s750_s27  }
 0x1b4 PF: > { %s775_s3 = sand.u32 1, %s1180_s9   ;;  %p1949_p12 = scmp.ne.s32.totalorder %s1937_s20, 0 }
 0x1b5   : > { %p1950_p0 = scmp.ge.s32.totalorder %s1200_s14, 2  ;;  %s776_s4 = scalar_lea.sflag [#allocation4], %s775_s3 }
 0x1b7   : > { %p973_p5 = pnand %p1950_p0, %p1949_p12 }
 0x1b9   : > { %1175 = dma.done.wait (!%p973_p5), %s776_s4, 16  }
 0x1ba   : > { %1177 = vsyncadd (!%p973_p5), %s776_s4, 4294967280  ;;  %s19_s14 = sadd.s32 1, %s1200_s14   ;;  %s1951_s9 = smov %s1184_s10 }
 0x1bb   : > { %p16_p10 = scmp.ge.s32.totalorder %s19_s14, 4   ;;  %s1952_s10 = smov %s1188_s11 }
 0x1bc   : > { %s1953_s11 = smov %s1340_s28  ;;  %s1954_s12 = smov %s1196_s13 }
 0x1bd   : > { %s1955_s13 = smov %s1957_s25  ;;  %18 = sbr.rel (!%p16_p10) target bundleno = 7 (0x7), region = 106 }
 0x1c4   :  { %780 = vsyncpa [#allocation3], 1 }
 0x1c5   :  { %782 = vsyncpa [#allocation3 + $0x1], 1 }
 0x1c6   :  { %783 = vsyncpa [#allocation6], 1 }
 0x1c7   :  { %785 = vsyncpa [#allocation6 + $0x1], 1 }
 0x1c8   :  { %786 = vsyncpa [#allocation4], 1 }
 0x1c9   :  { %788 = vsyncpa [#allocation4 + $0x1], 1 }

</bundles_post_ra>
